<compile_context>
chip_gen: v7x
topology: tpu7x:2x2x1
jax: 0.10.0
libtpu: 0.0.40
codegen_flags: <defaults>
</compile_context>

<pallas_src>
import functools

import jax
import jax.numpy as jnp
from jax.experimental import pallas as pl
from jax.experimental.pallas import tpu as pltpu

_LANE = 128
_SUBLANE = 8
_VMEM_BUDGET = 24 * 1024 * 1024      # working-set target; safe on v5e/v6e/v7x
_SELECT_MAX_U_DIM = 64               # threshold for the VPU select path


def _round_up(x: int, m: int) -> int:
    return ((x + m - 1) // m) * m


# ---------------------------------------------------------------------------
# Kernels
# ---------------------------------------------------------------------------

def _select_gather_kernel(u_ref, mean_tab_ref, logvar_tab_ref,
                          mean_ref, logvar_ref):
    """Small-u_dim path: unrolled VPU select-accumulate (no MXU, exact)."""
    idx = u_ref[...]                                  # (tile_b, 1) int32
    mean_tab = mean_tab_ref[...]                      # (u_dim, z_dim), VMEM-resident
    logvar_tab = logvar_tab_ref[...]
    u_dim = mean_tab.shape[0]
    tile_b = idx.shape[0]

    mean_acc = jnp.zeros((tile_b, mean_tab.shape[1]), mean_ref.dtype)
    logvar_acc = jnp.zeros((tile_b, logvar_tab.shape[1]), logvar_ref.dtype)
    for c in range(u_dim):                            # unrolled; u_dim small here
        hit = idx == c                                # (tile_b, 1) -> lane broadcast
        mean_acc = jnp.where(hit, mean_tab[c:c + 1, :], mean_acc)
        logvar_acc = jnp.where(hit, logvar_tab[c:c + 1, :], logvar_acc)
    mean_ref[...] = mean_acc
    logvar_ref[...] = logvar_acc


def _onehot_mxu_kernel(u_ref, mean_tab_ref, logvar_tab_ref,
                       mean_ref, logvar_ref):
    """Large-u_dim path: one-hot @ table on the MXU (exact 3-plane bf16 split)."""
    idx = u_ref[...]                                  # (tile_b, 1) int32
    tile_b = idx.shape[0]
    u_dim = mean_tab_ref.shape[0]
    iota = jax.lax.broadcasted_iota(jnp.int32, (tile_b, u_dim), 1)
    one_hot = (idx == iota).astype(jnp.bfloat16)      # {0,1} exact in bf16

    def gather(tab, out_ref):
        if tab.dtype == jnp.float32:
            # Exact split: b0 + b1 + b2 reconstructs the f32 value (3x8 = 24
            # mantissa bits); each single-pass bf16 matmul selects one plane's
            # row exactly, and the f32 sum recovers the original row.
            b0 = tab.astype(jnp.bfloat16)
            r1 = tab - b0.astype(jnp.float32)
            b1 = r1.astype(jnp.bfloat16)
            b2 = (r1 - b1.astype(jnp.float32)).astype(jnp.bfloat16)
            acc = jnp.dot(one_hot, b0, preferred_element_type=jnp.float32)
            acc = acc + jnp.dot(one_hot, b1, preferred_element_type=jnp.float32)
            acc = acc + jnp.dot(one_hot, b2, preferred_element_type=jnp.float32)
        else:
            acc = jnp.dot(one_hot, tab.astype(jnp.bfloat16),
                          preferred_element_type=jnp.float32)
        out_ref[...] = acc.astype(out_ref.dtype)

    gather(mean_tab_ref[...], mean_ref)
    gather(logvar_tab_ref[...], logvar_ref)


# ---------------------------------------------------------------------------
# Wrapper
# ---------------------------------------------------------------------------

def _vmem_estimate(tile_b, u_dim, z_dim, itemsize):
    z_pad = _round_up(z_dim, _LANE)
    u_pad = _round_up(u_dim, _SUBLANE)
    tables = 2 * u_pad * z_pad * itemsize             # Buffered(1): one buffer each
    labels = 2 * tile_b * _LANE * 4                   # (tile_b,1) int32, lane-padded, 2 bufs
    outs = 2 * 2 * tile_b * z_pad * itemsize          # two outputs, double-buffered
    return tables + labels + outs


def label_prior_discrete(u, mean_table, logvar_table, *, tile_b=None):
    """Pallas equivalent of LabelPriorDiscrete.forward(u) -> (mean, log_var)."""
    u_dim, z_dim = mean_table.shape
    assert logvar_table.shape == (u_dim, z_dim)
    mean_dtype = mean_table.dtype
    logvar_dtype = logvar_table.dtype
    itemsize = max(jnp.dtype(mean_dtype).itemsize,
                   jnp.dtype(logvar_dtype).itemsize, 4)

    u_shape = u.shape
    u_flat = u.reshape(-1).astype(jnp.int32)
    batch = u_flat.shape[0]

    if tile_b is None:
        tile_b = min(2048, _round_up(batch, _SUBLANE))
        if batch > _SUBLANE:
            # Ensure >= 2 grid steps so v7x can shard the batch axis over both TCs.
            tile_b = min(tile_b, _round_up((batch + 1) // 2, _SUBLANE))
    tile_b = max(_SUBLANE, _round_up(tile_b, _SUBLANE))
    while (tile_b > _SUBLANE
           and _vmem_estimate(tile_b, u_dim, z_dim, itemsize) > _VMEM_BUDGET):
        tile_b = max(_SUBLANE, _round_up(tile_b // 2, _SUBLANE))
    # TODO(synk): very large tables (u_dim * z_dim * itemsize approaching VMEM)
    # would need a chunked-u_dim grid axis + accumulator instead of full
    # table residency; not implemented (pi-VAE label counts are small).

    batch_p = _round_up(batch, tile_b)
    if batch_p != batch:
        # Pad with label 0 (a valid row); padded rows are sliced off below.
        u_col = jnp.zeros((batch_p, 1), jnp.int32).at[:batch, 0].set(u_flat)
    else:
        u_col = u_flat[:, None]

    kernel = (_select_gather_kernel if u_dim <= _SELECT_MAX_U_DIM
              else _onehot_mxu_kernel)

    # Resident (constant index_map) table blocks: single-buffered.
    resident = functools.partial(pl.BlockSpec, pipeline_mode=pl.Buffered(1))

    grid_spec = pltpu.PrefetchScalarGridSpec(
        num_scalar_prefetch=0,
        grid=(batch_p // tile_b,),
        in_specs=[
            pl.BlockSpec((tile_b, 1), lambda i: (i, 0)),          # labels
            resident((u_dim, z_dim), lambda i: (0, 0)),           # mean table
            resident((u_dim, z_dim), lambda i: (0, 0)),           # logvar table
        ],
        out_specs=(
            pl.BlockSpec((tile_b, z_dim), lambda i: (i, 0)),      # mean
            pl.BlockSpec((tile_b, z_dim), lambda i: (i, 0)),      # logvar
        ),
    )

    vmem_needed = _vmem_estimate(tile_b, u_dim, z_dim, itemsize)
    vmem_limit = int(min(48 * 1024 * 1024,
                         max(32 * 1024 * 1024, vmem_needed + 4 * 1024 * 1024)))

    mean_p, logvar_p = pl.pallas_call(
        kernel,
        grid_spec=grid_spec,
        out_shape=(
            jax.ShapeDtypeStruct((batch_p, z_dim), mean_dtype),
            jax.ShapeDtypeStruct((batch_p, z_dim), logvar_dtype),
        ),
        compiler_params=pltpu.CompilerParams(
            dimension_semantics=("parallel",),
            vmem_limit_bytes=vmem_limit,
        ),
    )(u_col, mean_table, logvar_table)

    if batch_p != batch:
        mean_p = mean_p[:batch]
        logvar_p = logvar_p[:batch]
    out_shape = (*u_shape, z_dim)
    # TODO(synk): PyTorch nn.Embedding raises on out-of-range labels; here an
    # out-of-range label yields an all-zero row instead of an error.
    return mean_p.reshape(out_shape), logvar_p.reshape(out_shape)


if __name__ == "__main__":
    key = jax.random.PRNGKey(0)

    def run_case(u_dim, z_dim, batch, case_key):
        k_mean, k_logvar, k_u = jax.random.split(case_key, 3)
        # nn.Embedding default init is N(0, 1); deterministic synthetic weights.
        mean_table = jax.random.normal(k_mean, (u_dim, z_dim), dtype=jnp.float32)
        logvar_table = jax.random.normal(k_logvar, (u_dim, z_dim), dtype=jnp.float32)
        u = jax.random.randint(k_u, (batch,), 0, u_dim, dtype=jnp.int32)

        mean, logvar = jax.jit(label_prior_discrete)(u, mean_table, logvar_table)
        jax.block_until_ready((mean, logvar))

        ref_mean, ref_logvar = mean_table[u], logvar_table[u]
        assert mean.shape == (batch, z_dim) and logvar.shape == (batch, z_dim)
        assert jnp.allclose(mean, ref_mean, rtol=1e-6, atol=1e-6)
        assert jnp.allclose(logvar, ref_logvar, rtol=1e-6, atol=1e-6)

    k1, k2 = jax.random.split(key)
    # Typical pi-VAE shapes: small u_dim -> VPU select path, grid=(1,), no padding.
    run_case(u_dim=16, z_dim=32, batch=8, case_key=k1)
    # Larger u_dim -> one-hot MXU path (exact bf16 3-plane split), 2 grid steps + padding.
    run_case(u_dim=96, z_dim=16, batch=24, case_key=k2)

    print("KERNEL_OK")
</pallas_src>

<mosaic_0001>
module attributes {stable_mosaic.version = 11 : i64} {
  func.func @_select_gather_kernel(%arg0: i32, %arg1: memref<8x1xi32, #tpu.memory_space<vmem>>, %arg2: memref<16x32xf32, #tpu.memory_space<vmem>>, %arg3: memref<16x32xf32, #tpu.memory_space<vmem>>, %arg4: memref<8x32xf32, #tpu.memory_space<vmem>>, %arg5: memref<8x32xf32, #tpu.memory_space<vmem>>) attributes {dimension_semantics = [#tpu.dimension_semantics<parallel>], iteration_bounds = array<i64: 1>, scalar_prefetch = 0 : i64, scratch_operands = 0 : i64, tpu.core_type = #tpu.core_type<tc>, window_params = [{transform_indices = @transform_0, window_bounds = array<i64: 8, 1>}, {pipeline_mode = #tpu.pipeline_mode<synchronous>, transform_indices = @transform_1, window_bounds = array<i64: 16, 32>}, {pipeline_mode = #tpu.pipeline_mode<synchronous>, transform_indices = @transform_2, window_bounds = array<i64: 16, 32>}, {transform_indices = @transform_3, window_bounds = array<i64: 8, 32>}, {transform_indices = @transform_4, window_bounds = array<i64: 8, 32>}]} {
    %c0 = arith.constant 0 : index
    %c0_0 = arith.constant 0 : index
    %0 = vector.load %arg1[%c0, %c0_0] : memref<8x1xi32, #tpu.memory_space<vmem>>, vector<8x1xi32>
    %c0_1 = arith.constant 0 : index
    %c0_2 = arith.constant 0 : index
    %1 = vector.load %arg2[%c0_1, %c0_2] : memref<16x32xf32, #tpu.memory_space<vmem>>, vector<16x32xf32>
    %c0_3 = arith.constant 0 : index
    %c0_4 = arith.constant 0 : index
    %2 = vector.load %arg3[%c0_3, %c0_4] : memref<16x32xf32, #tpu.memory_space<vmem>>, vector<16x32xf32>
    %cst = arith.constant 0.000000e+00 : f32
    %3 = vector.broadcast %cst : f32 to vector<8x32xf32>
    %cst_5 = arith.constant 0.000000e+00 : f32
    %4 = vector.broadcast %cst_5 : f32 to vector<8x32xf32>
    %c0_i32 = arith.constant 0 : i32
    %5 = vector.broadcast %c0_i32 : i32 to vector<8x1xi32>
    %6 = arith.cmpi eq, %0, %5 : vector<8x1xi32>
    %7 = vector.extract_strided_slice %1 {offsets = [0, 0], sizes = [1, 32], strides = [1, 1]} : vector<16x32xf32> to vector<1x32xf32>
    %8 = vector.shape_cast %6 : vector<8x1xi1> to vector<8x1xi1>
    %9 = vector.broadcast %8 : vector<8x1xi1> to vector<8x32xi1>
    %10 = vector.shape_cast %7 : vector<1x32xf32> to vector<1x32xf32>
    %11 = vector.broadcast %10 : vector<1x32xf32> to vector<8x32xf32>
    %12 = arith.select %9, %11, %3 : vector<8x32xi1>, vector<8x32xf32>
    %13 = vector.extract_strided_slice %2 {offsets = [0, 0], sizes = [1, 32], strides = [1, 1]} : vector<16x32xf32> to vector<1x32xf32>
    %14 = vector.shape_cast %6 : vector<8x1xi1> to vector<8x1xi1>
    %15 = vector.broadcast %14 : vector<8x1xi1> to vector<8x32xi1>
    %16 = vector.shape_cast %13 : vector<1x32xf32> to vector<1x32xf32>
    %17 = vector.broadcast %16 : vector<1x32xf32> to vector<8x32xf32>
    %18 = arith.select %15, %17, %4 : vector<8x32xi1>, vector<8x32xf32>
    %c1_i32 = arith.constant 1 : i32
    %19 = vector.broadcast %c1_i32 : i32 to vector<8x1xi32>
    %20 = arith.cmpi eq, %0, %19 : vector<8x1xi32>
    %21 = vector.extract_strided_slice %1 {offsets = [1, 0], sizes = [1, 32], strides = [1, 1]} : vector<16x32xf32> to vector<1x32xf32>
    %22 = vector.shape_cast %20 : vector<8x1xi1> to vector<8x1xi1>
    %23 = vector.broadcast %22 : vector<8x1xi1> to vector<8x32xi1>
    %24 = vector.shape_cast %21 : vector<1x32xf32> to vector<1x32xf32>
    %25 = vector.broadcast %24 : vector<1x32xf32> to vector<8x32xf32>
    %26 = arith.select %23, %25, %12 : vector<8x32xi1>, vector<8x32xf32>
    %27 = vector.extract_strided_slice %2 {offsets = [1, 0], sizes = [1, 32], strides = [1, 1]} : vector<16x32xf32> to vector<1x32xf32>
    %28 = vector.shape_cast %20 : vector<8x1xi1> to vector<8x1xi1>
    %29 = vector.broadcast %28 : vector<8x1xi1> to vector<8x32xi1>
    %30 = vector.shape_cast %27 : vector<1x32xf32> to vector<1x32xf32>
    %31 = vector.broadcast %30 : vector<1x32xf32> to vector<8x32xf32>
    %32 = arith.select %29, %31, %18 : vector<8x32xi1>, vector<8x32xf32>
    %c2_i32 = arith.constant 2 : i32
    %33 = vector.broadcast %c2_i32 : i32 to vector<8x1xi32>
    %34 = arith.cmpi eq, %0, %33 : vector<8x1xi32>
    %35 = vector.extract_strided_slice %1 {offsets = [2, 0], sizes = [1, 32], strides = [1, 1]} : vector<16x32xf32> to vector<1x32xf32>
    %36 = vector.shape_cast %34 : vector<8x1xi1> to vector<8x1xi1>
    %37 = vector.broadcast %36 : vector<8x1xi1> to vector<8x32xi1>
    %38 = vector.shape_cast %35 : vector<1x32xf32> to vector<1x32xf32>
    %39 = vector.broadcast %38 : vector<1x32xf32> to vector<8x32xf32>
    %40 = arith.select %37, %39, %26 : vector<8x32xi1>, vector<8x32xf32>
    %41 = vector.extract_strided_slice %2 {offsets = [2, 0], sizes = [1, 32], strides = [1, 1]} : vector<16x32xf32> to vector<1x32xf32>
    %42 = vector.shape_cast %34 : vector<8x1xi1> to vector<8x1xi1>
    %43 = vector.broadcast %42 : vector<8x1xi1> to vector<8x32xi1>
    %44 = vector.shape_cast %41 : vector<1x32xf32> to vector<1x32xf32>
    %45 = vector.broadcast %44 : vector<1x32xf32> to vector<8x32xf32>
    %46 = arith.select %43, %45, %32 : vector<8x32xi1>, vector<8x32xf32>
    %c3_i32 = arith.constant 3 : i32
    %47 = vector.broadcast %c3_i32 : i32 to vector<8x1xi32>
    %48 = arith.cmpi eq, %0, %47 : vector<8x1xi32>
    %49 = vector.extract_strided_slice %1 {offsets = [3, 0], sizes = [1, 32], strides = [1, 1]} : vector<16x32xf32> to vector<1x32xf32>
    %50 = vector.shape_cast %48 : vector<8x1xi1> to vector<8x1xi1>
    %51 = vector.broadcast %50 : vector<8x1xi1> to vector<8x32xi1>
    %52 = vector.shape_cast %49 : vector<1x32xf32> to vector<1x32xf32>
    %53 = vector.broadcast %52 : vector<1x32xf32> to vector<8x32xf32>
    %54 = arith.select %51, %53, %40 : vector<8x32xi1>, vector<8x32xf32>
    %55 = vector.extract_strided_slice %2 {offsets = [3, 0], sizes = [1, 32], strides = [1, 1]} : vector<16x32xf32> to vector<1x32xf32>
    %56 = vector.shape_cast %48 : vector<8x1xi1> to vector<8x1xi1>
    %57 = vector.broadcast %56 : vector<8x1xi1> to vector<8x32xi1>
    %58 = vector.shape_cast %55 : vector<1x32xf32> to vector<1x32xf32>
    %59 = vector.broadcast %58 : vector<1x32xf32> to vector<8x32xf32>
    %60 = arith.select %57, %59, %46 : vector<8x32xi1>, vector<8x32xf32>
    %c4_i32 = arith.constant 4 : i32
    %61 = vector.broadcast %c4_i32 : i32 to vector<8x1xi32>
    %62 = arith.cmpi eq, %0, %61 : vector<8x1xi32>
    %63 = vector.extract_strided_slice %1 {offsets = [4, 0], sizes = [1, 32], strides = [1, 1]} : vector<16x32xf32> to vector<1x32xf32>
    %64 = vector.shape_cast %62 : vector<8x1xi1> to vector<8x1xi1>
    %65 = vector.broadcast %64 : vector<8x1xi1> to vector<8x32xi1>
    %66 = vector.shape_cast %63 : vector<1x32xf32> to vector<1x32xf32>
    %67 = vector.broadcast %66 : vector<1x32xf32> to vector<8x32xf32>
    %68 = arith.select %65, %67, %54 : vector<8x32xi1>, vector<8x32xf32>
    %69 = vector.extract_strided_slice %2 {offsets = [4, 0], sizes = [1, 32], strides = [1, 1]} : vector<16x32xf32> to vector<1x32xf32>
    %70 = vector.shape_cast %62 : vector<8x1xi1> to vector<8x1xi1>
    %71 = vector.broadcast %70 : vector<8x1xi1> to vector<8x32xi1>
    %72 = vector.shape_cast %69 : vector<1x32xf32> to vector<1x32xf32>
    %73 = vector.broadcast %72 : vector<1x32xf32> to vector<8x32xf32>
    %74 = arith.select %71, %73, %60 : vector<8x32xi1>, vector<8x32xf32>
    %c5_i32 = arith.constant 5 : i32
    %75 = vector.broadcast %c5_i32 : i32 to vector<8x1xi32>
    %76 = arith.cmpi eq, %0, %75 : vector<8x1xi32>
    %77 = vector.extract_strided_slice %1 {offsets = [5, 0], sizes = [1, 32], strides = [1, 1]} : vector<16x32xf32> to vector<1x32xf32>
    %78 = vector.shape_cast %76 : vector<8x1xi1> to vector<8x1xi1>
    %79 = vector.broadcast %78 : vector<8x1xi1> to vector<8x32xi1>
    %80 = vector.shape_cast %77 : vector<1x32xf32> to vector<1x32xf32>
    %81 = vector.broadcast %80 : vector<1x32xf32> to vector<8x32xf32>
    %82 = arith.select %79, %81, %68 : vector<8x32xi1>, vector<8x32xf32>
    %83 = vector.extract_strided_slice %2 {offsets = [5, 0], sizes = [1, 32], strides = [1, 1]} : vector<16x32xf32> to vector<1x32xf32>
    %84 = vector.shape_cast %76 : vector<8x1xi1> to vector<8x1xi1>
    %85 = vector.broadcast %84 : vector<8x1xi1> to vector<8x32xi1>
    %86 = vector.shape_cast %83 : vector<1x32xf32> to vector<1x32xf32>
    %87 = vector.broadcast %86 : vector<1x32xf32> to vector<8x32xf32>
    %88 = arith.select %85, %87, %74 : vector<8x32xi1>, vector<8x32xf32>
    %c6_i32 = arith.constant 6 : i32
    %89 = vector.broadcast %c6_i32 : i32 to vector<8x1xi32>
    %90 = arith.cmpi eq, %0, %89 : vector<8x1xi32>
    %91 = vector.extract_strided_slice %1 {offsets = [6, 0], sizes = [1, 32], strides = [1, 1]} : vector<16x32xf32> to vector<1x32xf32>
    %92 = vector.shape_cast %90 : vector<8x1xi1> to vector<8x1xi1>
    %93 = vector.broadcast %92 : vector<8x1xi1> to vector<8x32xi1>
    %94 = vector.shape_cast %91 : vector<1x32xf32> to vector<1x32xf32>
    %95 = vector.broadcast %94 : vector<1x32xf32> to vector<8x32xf32>
    %96 = arith.select %93, %95, %82 : vector<8x32xi1>, vector<8x32xf32>
    %97 = vector.extract_strided_slice %2 {offsets = [6, 0], sizes = [1, 32], strides = [1, 1]} : vector<16x32xf32> to vector<1x32xf32>
    %98 = vector.shape_cast %90 : vector<8x1xi1> to vector<8x1xi1>
    %99 = vector.broadcast %98 : vector<8x1xi1> to vector<8x32xi1>
    %100 = vector.shape_cast %97 : vector<1x32xf32> to vector<1x32xf32>
    %101 = vector.broadcast %100 : vector<1x32xf32> to vector<8x32xf32>
    %102 = arith.select %99, %101, %88 : vector<8x32xi1>, vector<8x32xf32>
    %c7_i32 = arith.constant 7 : i32
    %103 = vector.broadcast %c7_i32 : i32 to vector<8x1xi32>
    %104 = arith.cmpi eq, %0, %103 : vector<8x1xi32>
    %105 = vector.extract_strided_slice %1 {offsets = [7, 0], sizes = [1, 32], strides = [1, 1]} : vector<16x32xf32> to vector<1x32xf32>
    %106 = vector.shape_cast %104 : vector<8x1xi1> to vector<8x1xi1>
    %107 = vector.broadcast %106 : vector<8x1xi1> to vector<8x32xi1>
    %108 = vector.shape_cast %105 : vector<1x32xf32> to vector<1x32xf32>
    %109 = vector.broadcast %108 : vector<1x32xf32> to vector<8x32xf32>
    %110 = arith.select %107, %109, %96 : vector<8x32xi1>, vector<8x32xf32>
    %111 = vector.extract_strided_slice %2 {offsets = [7, 0], sizes = [1, 32], strides = [1, 1]} : vector<16x32xf32> to vector<1x32xf32>
    %112 = vector.shape_cast %104 : vector<8x1xi1> to vector<8x1xi1>
    %113 = vector.broadcast %112 : vector<8x1xi1> to vector<8x32xi1>
    %114 = vector.shape_cast %111 : vector<1x32xf32> to vector<1x32xf32>
    %115 = vector.broadcast %114 : vector<1x32xf32> to vector<8x32xf32>
    %116 = arith.select %113, %115, %102 : vector<8x32xi1>, vector<8x32xf32>
    %c8_i32 = arith.constant 8 : i32
    %117 = vector.broadcast %c8_i32 : i32 to vector<8x1xi32>
    %118 = arith.cmpi eq, %0, %117 : vector<8x1xi32>
    %119 = vector.extract_strided_slice %1 {offsets = [8, 0], sizes = [1, 32], strides = [1, 1]} : vector<16x32xf32> to vector<1x32xf32>
    %120 = vector.shape_cast %118 : vector<8x1xi1> to vector<8x1xi1>
    %121 = vector.broadcast %120 : vector<8x1xi1> to vector<8x32xi1>
    %122 = vector.shape_cast %119 : vector<1x32xf32> to vector<1x32xf32>
    %123 = vector.broadcast %122 : vector<1x32xf32> to vector<8x32xf32>
    %124 = arith.select %121, %123, %110 : vector<8x32xi1>, vector<8x32xf32>
    %125 = vector.extract_strided_slice %2 {offsets = [8, 0], sizes = [1, 32], strides = [1, 1]} : vector<16x32xf32> to vector<1x32xf32>
    %126 = vector.shape_cast %118 : vector<8x1xi1> to vector<8x1xi1>
    %127 = vector.broadcast %126 : vector<8x1xi1> to vector<8x32xi1>
    %128 = vector.shape_cast %125 : vector<1x32xf32> to vector<1x32xf32>
    %129 = vector.broadcast %128 : vector<1x32xf32> to vector<8x32xf32>
    %130 = arith.select %127, %129, %116 : vector<8x32xi1>, vector<8x32xf32>
    %c9_i32 = arith.constant 9 : i32
    %131 = vector.broadcast %c9_i32 : i32 to vector<8x1xi32>
    %132 = arith.cmpi eq, %0, %131 : vector<8x1xi32>
    %133 = vector.extract_strided_slice %1 {offsets = [9, 0], sizes = [1, 32], strides = [1, 1]} : vector<16x32xf32> to vector<1x32xf32>
    %134 = vector.shape_cast %132 : vector<8x1xi1> to vector<8x1xi1>
    %135 = vector.broadcast %134 : vector<8x1xi1> to vector<8x32xi1>
    %136 = vector.shape_cast %133 : vector<1x32xf32> to vector<1x32xf32>
    %137 = vector.broadcast %136 : vector<1x32xf32> to vector<8x32xf32>
    %138 = arith.select %135, %137, %124 : vector<8x32xi1>, vector<8x32xf32>
    %139 = vector.extract_strided_slice %2 {offsets = [9, 0], sizes = [1, 32], strides = [1, 1]} : vector<16x32xf32> to vector<1x32xf32>
    %140 = vector.shape_cast %132 : vector<8x1xi1> to vector<8x1xi1>
    %141 = vector.broadcast %140 : vector<8x1xi1> to vector<8x32xi1>
    %142 = vector.shape_cast %139 : vector<1x32xf32> to vector<1x32xf32>
    %143 = vector.broadcast %142 : vector<1x32xf32> to vector<8x32xf32>
    %144 = arith.select %141, %143, %130 : vector<8x32xi1>, vector<8x32xf32>
    %c10_i32 = arith.constant 10 : i32
    %145 = vector.broadcast %c10_i32 : i32 to vector<8x1xi32>
    %146 = arith.cmpi eq, %0, %145 : vector<8x1xi32>
    %147 = vector.extract_strided_slice %1 {offsets = [10, 0], sizes = [1, 32], strides = [1, 1]} : vector<16x32xf32> to vector<1x32xf32>
    %148 = vector.shape_cast %146 : vector<8x1xi1> to vector<8x1xi1>
    %149 = vector.broadcast %148 : vector<8x1xi1> to vector<8x32xi1>
    %150 = vector.shape_cast %147 : vector<1x32xf32> to vector<1x32xf32>
    %151 = vector.broadcast %150 : vector<1x32xf32> to vector<8x32xf32>
    %152 = arith.select %149, %151, %138 : vector<8x32xi1>, vector<8x32xf32>
    %153 = vector.extract_strided_slice %2 {offsets = [10, 0], sizes = [1, 32], strides = [1, 1]} : vector<16x32xf32> to vector<1x32xf32>
    %154 = vector.shape_cast %146 : vector<8x1xi1> to vector<8x1xi1>
    %155 = vector.broadcast %154 : vector<8x1xi1> to vector<8x32xi1>
    %156 = vector.shape_cast %153 : vector<1x32xf32> to vector<1x32xf32>
    %157 = vector.broadcast %156 : vector<1x32xf32> to vector<8x32xf32>
    %158 = arith.select %155, %157, %144 : vector<8x32xi1>, vector<8x32xf32>
    %c11_i32 = arith.constant 11 : i32
    %159 = vector.broadcast %c11_i32 : i32 to vector<8x1xi32>
    %160 = arith.cmpi eq, %0, %159 : vector<8x1xi32>
    %161 = vector.extract_strided_slice %1 {offsets = [11, 0], sizes = [1, 32], strides = [1, 1]} : vector<16x32xf32> to vector<1x32xf32>
    %162 = vector.shape_cast %160 : vector<8x1xi1> to vector<8x1xi1>
    %163 = vector.broadcast %162 : vector<8x1xi1> to vector<8x32xi1>
    %164 = vector.shape_cast %161 : vector<1x32xf32> to vector<1x32xf32>
    %165 = vector.broadcast %164 : vector<1x32xf32> to vector<8x32xf32>
    %166 = arith.select %163, %165, %152 : vector<8x32xi1>, vector<8x32xf32>
    %167 = vector.extract_strided_slice %2 {offsets = [11, 0], sizes = [1, 32], strides = [1, 1]} : vector<16x32xf32> to vector<1x32xf32>
    %168 = vector.shape_cast %160 : vector<8x1xi1> to vector<8x1xi1>
    %169 = vector.broadcast %168 : vector<8x1xi1> to vector<8x32xi1>
    %170 = vector.shape_cast %167 : vector<1x32xf32> to vector<1x32xf32>
    %171 = vector.broadcast %170 : vector<1x32xf32> to vector<8x32xf32>
    %172 = arith.select %169, %171, %158 : vector<8x32xi1>, vector<8x32xf32>
    %c12_i32 = arith.constant 12 : i32
    %173 = vector.broadcast %c12_i32 : i32 to vector<8x1xi32>
    %174 = arith.cmpi eq, %0, %173 : vector<8x1xi32>
    %175 = vector.extract_strided_slice %1 {offsets = [12, 0], sizes = [1, 32], strides = [1, 1]} : vector<16x32xf32> to vector<1x32xf32>
    %176 = vector.shape_cast %174 : vector<8x1xi1> to vector<8x1xi1>
    %177 = vector.broadcast %176 : vector<8x1xi1> to vector<8x32xi1>
    %178 = vector.shape_cast %175 : vector<1x32xf32> to vector<1x32xf32>
    %179 = vector.broadcast %178 : vector<1x32xf32> to vector<8x32xf32>
    %180 = arith.select %177, %179, %166 : vector<8x32xi1>, vector<8x32xf32>
    %181 = vector.extract_strided_slice %2 {offsets = [12, 0], sizes = [1, 32], strides = [1, 1]} : vector<16x32xf32> to vector<1x32xf32>
    %182 = vector.shape_cast %174 : vector<8x1xi1> to vector<8x1xi1>
    %183 = vector.broadcast %182 : vector<8x1xi1> to vector<8x32xi1>
    %184 = vector.shape_cast %181 : vector<1x32xf32> to vector<1x32xf32>
    %185 = vector.broadcast %184 : vector<1x32xf32> to vector<8x32xf32>
    %186 = arith.select %183, %185, %172 : vector<8x32xi1>, vector<8x32xf32>
    %c13_i32 = arith.constant 13 : i32
    %187 = vector.broadcast %c13_i32 : i32 to vector<8x1xi32>
    %188 = arith.cmpi eq, %0, %187 : vector<8x1xi32>
    %189 = vector.extract_strided_slice %1 {offsets = [13, 0], sizes = [1, 32], strides = [1, 1]} : vector<16x32xf32> to vector<1x32xf32>
    %190 = vector.shape_cast %188 : vector<8x1xi1> to vector<8x1xi1>
    %191 = vector.broadcast %190 : vector<8x1xi1> to vector<8x32xi1>
    %192 = vector.shape_cast %189 : vector<1x32xf32> to vector<1x32xf32>
    %193 = vector.broadcast %192 : vector<1x32xf32> to vector<8x32xf32>
    %194 = arith.select %191, %193, %180 : vector<8x32xi1>, vector<8x32xf32>
    %195 = vector.extract_strided_slice %2 {offsets = [13, 0], sizes = [1, 32], strides = [1, 1]} : vector<16x32xf32> to vector<1x32xf32>
    %196 = vector.shape_cast %188 : vector<8x1xi1> to vector<8x1xi1>
    %197 = vector.broadcast %196 : vector<8x1xi1> to vector<8x32xi1>
    %198 = vector.shape_cast %195 : vector<1x32xf32> to vector<1x32xf32>
    %199 = vector.broadcast %198 : vector<1x32xf32> to vector<8x32xf32>
    %200 = arith.select %197, %199, %186 : vector<8x32xi1>, vector<8x32xf32>
    %c14_i32 = arith.constant 14 : i32
    %201 = vector.broadcast %c14_i32 : i32 to vector<8x1xi32>
    %202 = arith.cmpi eq, %0, %201 : vector<8x1xi32>
    %203 = vector.extract_strided_slice %1 {offsets = [14, 0], sizes = [1, 32], strides = [1, 1]} : vector<16x32xf32> to vector<1x32xf32>
    %204 = vector.shape_cast %202 : vector<8x1xi1> to vector<8x1xi1>
    %205 = vector.broadcast %204 : vector<8x1xi1> to vector<8x32xi1>
    %206 = vector.shape_cast %203 : vector<1x32xf32> to vector<1x32xf32>
    %207 = vector.broadcast %206 : vector<1x32xf32> to vector<8x32xf32>
    %208 = arith.select %205, %207, %194 : vector<8x32xi1>, vector<8x32xf32>
    %209 = vector.extract_strided_slice %2 {offsets = [14, 0], sizes = [1, 32], strides = [1, 1]} : vector<16x32xf32> to vector<1x32xf32>
    %210 = vector.shape_cast %202 : vector<8x1xi1> to vector<8x1xi1>
    %211 = vector.broadcast %210 : vector<8x1xi1> to vector<8x32xi1>
    %212 = vector.shape_cast %209 : vector<1x32xf32> to vector<1x32xf32>
    %213 = vector.broadcast %212 : vector<1x32xf32> to vector<8x32xf32>
    %214 = arith.select %211, %213, %200 : vector<8x32xi1>, vector<8x32xf32>
    %c15_i32 = arith.constant 15 : i32
    %215 = vector.broadcast %c15_i32 : i32 to vector<8x1xi32>
    %216 = arith.cmpi eq, %0, %215 : vector<8x1xi32>
    %217 = vector.extract_strided_slice %1 {offsets = [15, 0], sizes = [1, 32], strides = [1, 1]} : vector<16x32xf32> to vector<1x32xf32>
    %218 = vector.shape_cast %216 : vector<8x1xi1> to vector<8x1xi1>
    %219 = vector.broadcast %218 : vector<8x1xi1> to vector<8x32xi1>
    %220 = vector.shape_cast %217 : vector<1x32xf32> to vector<1x32xf32>
    %221 = vector.broadcast %220 : vector<1x32xf32> to vector<8x32xf32>
    %222 = arith.select %219, %221, %208 : vector<8x32xi1>, vector<8x32xf32>
    %223 = vector.extract_strided_slice %2 {offsets = [15, 0], sizes = [1, 32], strides = [1, 1]} : vector<16x32xf32> to vector<1x32xf32>
    %224 = vector.shape_cast %216 : vector<8x1xi1> to vector<8x1xi1>
    %225 = vector.broadcast %224 : vector<8x1xi1> to vector<8x32xi1>
    %226 = vector.shape_cast %223 : vector<1x32xf32> to vector<1x32xf32>
    %227 = vector.broadcast %226 : vector<1x32xf32> to vector<8x32xf32>
    %228 = arith.select %225, %227, %214 : vector<8x32xi1>, vector<8x32xf32>
    %c0_6 = arith.constant 0 : index
    %c0_7 = arith.constant 0 : index
    %229 = vector.load %arg4[%c0_6, %c0_7] : memref<8x32xf32, #tpu.memory_space<vmem>>, vector<8x32xf32>
    tpu.vector_store %arg4[%c0_6, %c0_7], %222 {strides = array<i32>} : memref<8x32xf32, #tpu.memory_space<vmem>>, vector<8x32xf32>,
    %c0_8 = arith.constant 0 : index
    %c0_9 = arith.constant 0 : index
    %230 = vector.load %arg5[%c0_8, %c0_9] : memref<8x32xf32, #tpu.memory_space<vmem>>, vector<8x32xf32>
    tpu.vector_store %arg5[%c0_8, %c0_9], %228 {strides = array<i32>} : memref<8x32xf32, #tpu.memory_space<vmem>>, vector<8x32xf32>,
    return
  }
  func.func @transform_0(%arg0: i32) -> (i32, i32) {
    %c0_i32 = arith.constant 0 : i32
    %c0_i32_0 = arith.constant 0 : i32
    return %arg0, %c0_i32 : i32, i32
  }
  func.func @transform_1(%arg0: i32) -> (i32, i32) {
    %c0_i32 = arith.constant 0 : i32
    %c0_i32_0 = arith.constant 0 : i32
    %c0_i32_1 = arith.constant 0 : i32
    return %c0_i32, %c0_i32_0 : i32, i32
  }
  func.func @transform_2(%arg0: i32) -> (i32, i32) {
    %c0_i32 = arith.constant 0 : i32
    %c0_i32_0 = arith.constant 0 : i32
    %c0_i32_1 = arith.constant 0 : i32
    return %c0_i32, %c0_i32_0 : i32, i32
  }
  func.func @transform_3(%arg0: i32) -> (i32, i32) {
    %c0_i32 = arith.constant 0 : i32
    %c0_i32_0 = arith.constant 0 : i32
    return %arg0, %c0_i32 : i32, i32
  }
  func.func @transform_4(%arg0: i32) -> (i32, i32) {
    %c0_i32 = arith.constant 0 : i32
    %c0_i32_0 = arith.constant 0 : i32
    return %arg0, %c0_i32 : i32, i32
  }
}

</mosaic_0001>

<bundles_post_ra>
// kernel: label_prior_discrete.1
= control target key start
LH: loop header
LB: loop body
LE: loop exit
PB: predicated region body
PF: predicated region fallthrough
CT: control target
= control target key end

     0   :  { %10 = vsyncpa [#allocation3], 0  ;;  %s569_s0 = inlined_call_operand.vmem [shape: s32[8,1], index: 0, kind: input, shape index: {}]   ;;  %s570_s1 = inlined_call_operand.vmem [shape: f32[16,32], index: 1, kind: input, shape index: {}]   ;;  %s571_s2 = inlined_call_operand.hbm [shape: f32[16,32], index: 2, kind: input, shape index: {}]   ;;  %s572_s3 = inlined_call_operand.hbm [shape: f32[8,32], index: 3, kind: output, shape index: {0}]   ;;  %s573_s4 = inlined_call_operand.hbm [shape: f32[8,32], index: 4, kind: output, shape index: {1}]  }
   0x1   :  { %11 = vsyncpa [#allocation4], 0 }
   0x2   :  { %12 = vsyncpa [#allocation7], 0  ;;  %s405_s15 = smov [#allocation2]   ;;  %s333_s19 = scalar_lea.hbm %s571_s2, 256 }
   0x3   :  { %s22_s16 = sshll.u32 %s405_s15, 4  ;;  %p334_p0 = scmp.ne.s32.totalorder %s571_s2, %s333_s19  ;;  %s23_s16 = int_to_ptr.vmem [resolvable:$true] %s22_s16 }
   0x4   :  { %p337_p1 = scmp.lt.u32.totalorder %s333_s19, %s571_s2 }
   0x6   :  { %p339_p2 = pnand %p337_p1, %p334_p0 }
   0x8   :  { %342 = shalt.err (!%p339_p2)
}
   0x9   :  { %s343_s24 = scalar_lea.vmem %s23_s16, 256  ;;  %p348_p4 = scmp.lt.s32.totalorder %s23_s16, %s23_s16 }
   0xa   :  { %p344_p3 = scmp.ne.s32.totalorder %s23_s16, %s343_s24  ;;  %p349_p5 = scmp.lt.s32.totalorder %s343_s24, %s343_s24 }
   0xc   :  { %p350_p6 = por %p349_p5, %p348_p4 }
   0xe   :  { %p351_p7 = pnand %p350_p6, %p344_p3 }
  0x10   :  { %354 = shalt.err (!%p351_p7)
}
  0x11   :  { %s406_s25 = smov 128   ;;  %s407_s26 = smov 8  }
  0x12   :  { %28 = dma.hbm_to_vmem [thread:$0]  %s571_s2, 256, %s23_s16, [#allocation3], %s406_s25, %s406_s25, %s407_s26  }
  0x13   :  { %399 = dma.done.wait [#allocation3], 256  }
  0x14   :  { %400 = vsyncadd [#allocation3], 4294967040  ;;  %v408_v0 = vmov 0   ;;  %v32_v1 = vld [vmem:[%s569_s0] sm:$0xff]  ;;  %v43_v18 = vlaneseq  ;;  %v505_v60 = vld [vmem:[%s570_s1 + $0x8] sm:$0xff]  ;;  %s410_s8 = smov [#allocation6]  }
  0x15   :  { %332 = vset.pattern.permute.xlu1 %v408_v0  ;;  %331 = vset.pattern.permute.xlu0 %v408_v0  ;;  %vm69_vm0 = vcmp.eq.s32.totalorder %v32_v1, 2  ;;  %vm37_vm1 = vcmp.eq.s32.totalorder %v32_v1, 0  ;;  %vm85_vm2 = vcmp.eq.s32.totalorder %v32_v1, 3  ;;  %vm53_vm3 = vcmp.eq.s32.totalorder %v32_v1, 1  ;;  %v456_v21 = vld [vmem:[%s570_s1] sm:$0xff]  ;;  %v507_v61 = vld [vmem:[#allocation2 + $0x8] sm:$0xff] }
  0x16   :  { %v70_v2 = vsel %vm69_vm0, 1, %v408_v0  ;;  %v38_v3 = vsel %vm37_vm1, 1, %v408_v0  ;;  %v86_v4 = vsel %vm85_vm2, 1, %v408_v0  ;;  %v54_v5 = vsel %vm53_vm3, 1, %v408_v0  ;;  %v458_v22 = vld [vmem:[#allocation2] sm:$0xff]  ;;  %s409_s1 = smov [#allocation5]  }
  0x17   :  { %72 = vperm.xlu1 %332, %v70_v2   ;;  %40 = vperm.xlu0 %331, %v38_v3   ;;  %vm117_vm4 = vcmp.eq.s32.totalorder %v32_v1, 5  ;;  %vm101_vm5 = vcmp.eq.s32.totalorder %v32_v1, 4  ;;  %vm149_vm6 = vcmp.eq.s32.totalorder %v32_v1, 7  ;;  %vm133_vm7 = vcmp.eq.s32.totalorder %v32_v1, 6  ;;  %s302_s7 = sshll.u32 %s409_s1, 4  ;;  %s312_s9 = sshll.u32 %s410_s8, 4  ;;  %s303_s7 = int_to_ptr.vmem [resolvable:$true] %s302_s7  ;;  %s313_s9 = int_to_ptr.vmem [resolvable:$true] %s312_s9 }
  0x18   :  { %v118_v6 = vsel %vm117_vm4, 1, %v408_v0  ;;  %v102_v7 = vsel %vm101_vm5, 1, %v408_v0  ;;  %v150_v8 = vsel %vm149_vm6, 1, %v408_v0  ;;  %v134_v9 = vsel %vm133_vm7, 1, %v408_v0  ;;  %s355_s10 = scalar_lea.vmem %s303_s7, 128  ;;  %p360_p9 = scmp.lt.s32.totalorder %s303_s7, %s303_s7 }
  0x19   :  { %vm181_vm8 = vcmp.eq.s32.totalorder %v32_v1, 9  ;;  %vm165_vm9 = vcmp.eq.s32.totalorder %v32_v1, 8  ;;  %vm213_vm10 = vcmp.eq.s32.totalorder %v32_v1, 11  ;;  %vm197_vm11 = vcmp.eq.s32.totalorder %v32_v1, 10  ;;  %p356_p8 = scmp.ne.s32.totalorder %s303_s7, %s355_s10  ;;  %p361_p10 = scmp.lt.s32.totalorder %s355_s10, %s355_s10 }
  0x1a   :  { %v182_v10 = vsel %vm181_vm8, 1, %v408_v0  ;;  %v166_v11 = vsel %vm165_vm9, 1, %v408_v0  ;;  %v214_v12 = vsel %vm213_vm10, 1, %v408_v0  ;;  %v198_v13 = vsel %vm197_vm11, 1, %v408_v0 }
  0x1b   :  { %88 = vperm.xlu1 %332, %v86_v4   ;;  %56 = vperm.xlu0 %331, %v54_v5   ;;  %vm245_vm12 = vcmp.eq.s32.totalorder %v32_v1, 13  ;;  %vm229_vm13 = vcmp.eq.s32.totalorder %v32_v1, 12  ;;  %vm277_vm14 = vcmp.eq.s32.totalorder %v32_v1, 15  ;;  %vm261_vm15 = vcmp.eq.s32.totalorder %v32_v1, 14  ;;  %p362_p11 = por %p361_p10, %p360_p9 }
  0x1c   :  { %v246_v14 = vsel %vm245_vm12, 1, %v408_v0  ;;  %v230_v15 = vsel %vm229_vm13, 1, %v408_v0  ;;  %v278_v16 = vsel %vm277_vm14, 1, %v408_v0  ;;  %v262_v17 = vsel %vm261_vm15, 1, %v408_v0 }
  0x1d   :  { %v44_v19 = vshrl.u32 %v43_v18, 7  ;;  %vm293_vm14 = vcmask 261120   ;;  %p363_p12 = pnand %p362_p11, %p356_p8 }
  0x1f   :  { %120 = vperm.xlu1 %332, %v118_v6   ;;  %104 = vperm.xlu0 %331, %v102_v7   ;;  %v451_v20 = vsub.s32 0, %v44_v19  ;;  %v460_v23 = vsub.s32 1, %v44_v19  ;;  %v462_v24 = vsub.s32 2, %v44_v19  ;;  %v464_v27 = vsub.s32 3, %v44_v19 }
  0x20   :  { %v466_v28 = vsub.s32 4, %v44_v19  ;;  %v486_v40 = vsub.s32 5, %v44_v19  ;;  %v488_v43 = vsub.s32 6, %v44_v19  ;;  %v492_v53 = vsub.s32 7, %v44_v19 }
  0x21   :  { %v46_v29 = vrot.slane %v456_v21, %v451_v20  ;;  %v51_v30 = vrot.slane %v458_v22, %v451_v20  ;;  %v62_v31 = vrot.slane %v456_v21, %v460_v23  ;;  %v67_v32 = vrot.slane %v458_v22, %v460_v23 }
  0x22   :  { %v78_v33 = vrot.slane %v456_v21, %v462_v24  ;;  %v83_v34 = vrot.slane %v458_v22, %v462_v24  ;;  %v94_v37 = vrot.slane %v456_v21, %v464_v27  ;;  %v99_v38 = vrot.slane %v458_v22, %v464_v27 }
  0x23   :  { %152 = vperm.xlu1 %332, %v150_v8   ;;  %136 = vperm.xlu0 %331, %v134_v9   ;;  %v110_v39 = vrot.slane %v456_v21, %v466_v28  ;;  %v115_v46 = vrot.slane %v458_v22, %v466_v28  ;;  %v126_v54 = vrot.slane %v456_v21, %v486_v40 }
  0x24   :  { %v131_v55 = vrot.slane %v458_v22, %v486_v40  ;;  %v142_v56 = vrot.slane %v456_v21, %v488_v43  ;;  %v147_v59 = vrot.slane %v458_v22, %v488_v43  ;;  %v158_v0 = vrot.slane %v456_v21, %v492_v53 }
  0x25   :  { %v163_v1 = vrot.slane %v458_v22, %v492_v53  ;;  %v174_v4 = vrot.slane %v505_v60, %v451_v20  ;;  %v179_v7 = vrot.slane %v507_v61, %v451_v20  ;;  %v222_v20 = vrot.slane %v505_v60, %v464_v27 }
  0x26   :  { %v227_v21 = vrot.slane %v507_v61, %v464_v27  ;;  %v259_v27 = vrot.slane %v507_v61, %v486_v40 }
  0x27   :  { %184 = vperm.xlu1 %332, %v182_v10   ;;  %168 = vperm.xlu0 %331, %v166_v11   ;;  %v190_v10 = vrot.slane %v505_v60, %v460_v23  ;;  %v195_v11 = vrot.slane %v507_v61, %v460_v23 }
  0x2b   :  { %216 = vperm.xlu1 %332, %v214_v12   ;;  %200 = vperm.xlu0 %331, %v198_v13  }
  0x2f   :  { %248 = vperm.xlu1 %332, %v246_v14   ;;  %232 = vperm.xlu0 %331, %v230_v15   ;;  %v206_v14 = vrot.slane %v505_v60, %v462_v24 }
  0x33   :  { %280 = vperm.xlu1 %332, %v278_v16   ;;  %264 = vperm.xlu0 %331, %v262_v17   ;;  %v211_v17 = vrot.slane %v507_v61, %v462_v24  ;;  %v243_v24 = vrot.slane %v507_v61, %v466_v28 }
  0x96   :  { %v73_v25 = vpop.permute.xlu1 %72  ;;  %v41_v26 = vpop.permute.xlu0 %40 }
  0x97   :  { %vm42_vm0 = vcmp.eq.s32.totalorder %v41_v26, 1  ;;  %vm74_vm2 = vcmp.eq.s32.totalorder %v73_v25, 1  ;;  %v238_v25 = vrot.slane %v505_v60, %v466_v28  ;;  %v275_v28 = vrot.slane %v507_v61, %v488_v43 }
  0x98   :  { %v47_v41 = vsel %vm42_vm0, %v46_v29, 0.0  ;;  %v52_v42 = vsel %vm42_vm0, %v51_v30, 0.0 }
  0x9a   :  { %v89_v35 = vpop.permute.xlu1 %88  ;;  %v57_v36 = vpop.permute.xlu0 %56 }
  0x9b   :  { %vm58_vm1 = vcmp.eq.s32.totalorder %v57_v36, 1  ;;  %vm90_vm3 = vcmp.eq.s32.totalorder %v89_v35, 1  ;;  %v270_v35 = vrot.slane %v505_v60, %v488_v43 }
  0x9c   :  { %v63_v44 = vsel %vm58_vm1, %v62_v31, %v47_v41  ;;  %v68_v45 = vsel %vm58_vm1, %v67_v32, %v52_v42  ;;  %v254_v32 = vrot.slane %v505_v60, %v486_v40 }
  0x9d   :  { %v79_v47 = vsel %vm74_vm2, %v78_v33, %v63_v44  ;;  %v84_v48 = vsel %vm74_vm2, %v83_v34, %v68_v45 }
  0x9e   :  { %v121_v49 = vpop.permute.xlu1 %120  ;;  %v95_v50 = vsel %vm90_vm3, %v94_v37, %v79_v47  ;;  %v100_v51 = vsel %vm90_vm3, %v99_v38, %v84_v48  ;;  %v105_v52 = vpop.permute.xlu0 %104  ;;  %v286_v38 = vrot.slane %v505_v60, %v492_v53 }
  0x9f   :  { %vm106_vm4 = vcmp.eq.s32.totalorder %v105_v52, 1  ;;  %vm122_vm5 = vcmp.eq.s32.totalorder %v121_v49, 1 }
  0xa0   :  { %v111_v57 = vsel %vm106_vm4, %v110_v39, %v95_v50  ;;  %v116_v58 = vsel %vm106_vm4, %v115_v46, %v100_v51  ;;  %v291_v39 = vrot.slane %v507_v61, %v492_v53 }
  0xa1   :  { %v127_v2 = vsel %vm122_vm5, %v126_v54, %v111_v57  ;;  %v132_v3 = vsel %vm122_vm5, %v131_v55, %v116_v58 }
  0xa2   :  { %v153_v62 = vpop.permute.xlu1 %152  ;;  %v137_v63 = vpop.permute.xlu0 %136 }
  0xa3   :  { %vm138_vm6 = vcmp.eq.s32.totalorder %v137_v63, 1  ;;  %vm154_vm7 = vcmp.eq.s32.totalorder %v153_v62, 1 }
  0xa4   :  { %v143_v5 = vsel %vm138_vm6, %v142_v56, %v127_v2  ;;  %v148_v6 = vsel %vm138_vm6, %v147_v59, %v132_v3 }
  0xa5   :  { %v159_v12 = vsel %vm154_vm7, %v158_v0, %v143_v5  ;;  %v164_v13 = vsel %vm154_vm7, %v163_v1, %v148_v6 }
  0xa6   :  { %v185_v8 = vpop.permute.xlu1 %184  ;;  %v169_v9 = vpop.permute.xlu0 %168 }
  0xa7   :  { %vm170_vm8 = vcmp.eq.s32.totalorder %v169_v9, 1  ;;  %vm186_vm9 = vcmp.eq.s32.totalorder %v185_v8, 1 }
  0xa8   :  { %v175_v15 = vsel %vm170_vm8, %v174_v4, %v159_v12  ;;  %v180_v16 = vsel %vm170_vm8, %v179_v7, %v164_v13 }
  0xa9   :  { %v191_v22 = vsel %vm186_vm9, %v190_v10, %v175_v15  ;;  %v196_v23 = vsel %vm186_vm9, %v195_v11, %v180_v16 }
  0xaa   :  { %v217_v18 = vpop.permute.xlu1 %216  ;;  %v201_v19 = vpop.permute.xlu0 %200 }
  0xab   :  { %vm202_vm10 = vcmp.eq.s32.totalorder %v201_v19, 1  ;;  %vm218_vm11 = vcmp.eq.s32.totalorder %v217_v18, 1 }
  0xac   :  { %v207_v26 = vsel %vm202_vm10, %v206_v14, %v191_v22  ;;  %v212_v29 = vsel %vm202_vm10, %v211_v17, %v196_v23 }
  0xad   :  { %v223_v33 = vsel %vm218_vm11, %v222_v20, %v207_v26  ;;  %v228_v34 = vsel %vm218_vm11, %v227_v21, %v212_v29 }
  0xae   :  { %v249_v30 = vpop.permute.xlu1 %248  ;;  %v233_v31 = vpop.permute.xlu0 %232 }
  0xaf   :  { %vm234_vm12 = vcmp.eq.s32.totalorder %v233_v31, 1  ;;  %vm250_vm13 = vcmp.eq.s32.totalorder %v249_v30, 1 }
  0xb0   :  { %v239_v36 = vsel %vm234_vm12, %v238_v25, %v223_v33  ;;  %v244_v37 = vsel %vm234_vm12, %v243_v24, %v228_v34 }
  0xb1   :  { %v255_v42 = vsel %vm250_vm13, %v254_v32, %v239_v36  ;;  %v260_v44 = vsel %vm250_vm13, %v259_v27, %v244_v37 }
  0xb2   :  { %v281_v40 = vpop.permute.xlu1 %280  ;;  %v265_v41 = vpop.permute.xlu0 %264 }
  0xb3   :  { %vm282_vm15 = vcmp.eq.s32.totalorder %v281_v40, 1  ;;  %vm266_vm0 = vcmp.eq.s32.totalorder %v265_v41, 1 }
  0xb4   :  { %v271_v45 = vsel %vm266_vm0, %v270_v35, %v255_v42  ;;  %v276_v46 = vsel %vm266_vm0, %v275_v28, %v260_v44 }
  0xb5   :  { %v287_v43 = vsel %vm282_vm15, %v286_v38, %v271_v45  ;;  %v292_v47 = vsel %vm282_vm15, %v291_v39, %v276_v46 }
  0xb6   :  { %294 = vst.msk [vmem:[#allocation5] sm:$0xff] %vm293_vm14, %v287_v43  ;;  %295 = vst.msk [vmem:[#allocation6] sm:$0xff] %vm293_vm14, %v292_v47 }
  0xb7   :  { %366 = shalt.err (!%p363_p12)
}
  0xb8   :  { %s367_s13 = scalar_lea.hbm %s572_s3, 128 }
  0xb9   :  { %p368_p13 = scmp.ne.s32.totalorder %s572_s3, %s367_s13  ;;  %p371_p0 = scmp.lt.u32.totalorder %s367_s13, %s572_s3 }
  0xbb   :  { %p373_p1 = pnand %p371_p0, %p368_p13 }
  0xbd   :  { %376 = shalt.err (!%p373_p1)
}
  0xbe   :  { %305 = dma.vmem_to_hbm [thread:$0]  %s303_s7, 128, %s572_s3, [#allocation4]  }
  0xbf   :  { %s377_s20 = scalar_lea.vmem %s313_s9, 128  ;;  %p382_p3 = scmp.lt.s32.totalorder %s313_s9, %s313_s9 }
  0xc0   :  { %p378_p2 = scmp.ne.s32.totalorder %s313_s9, %s377_s20  ;;  %p383_p4 = scmp.lt.s32.totalorder %s377_s20, %s377_s20 }
  0xc2   :  { %p384_p5 = por %p383_p4, %p382_p3 }
  0xc4   :  { %p385_p6 = pnand %p384_p5, %p378_p2 }
  0xc6   :  { %388 = shalt.err (!%p385_p6)
}
  0xc7   :  { %s389_s23 = scalar_lea.hbm %s573_s4, 128 }
  0xc8   :  { %p390_p7 = scmp.ne.s32.totalorder %s573_s4, %s389_s23  ;;  %p393_p8 = scmp.lt.u32.totalorder %s389_s23, %s573_s4 }
  0xca   :  { %p395_p9 = pnand %p393_p8, %p390_p7 }
  0xcc   :  { %398 = shalt.err (!%p395_p9)
}
  0xcd   :  { %315 = dma.vmem_to_hbm [thread:$0]  %s313_s9, 128, %s573_s4, [#allocation7]  }
  0xce   :  { %401 = dma.done.wait [#allocation4], 128  }
  0xcf   :  { %402 = vsyncadd [#allocation4], 4294967168 }
  0xd0   :  { %403 = dma.done.wait [#allocation7], 128  }
  0xd1   :  { %404 = vsyncadd [#allocation7], 4294967168 }
  0xd2   :  { %322 = vsyncpa [#allocation3], 1 }
  0xd3   :  { %323 = vsyncpa [#allocation4], 1 }
  0xd4   :  { %324 = vsyncpa [#allocation7], 1 }

</bundles_post_ra>
